<compile_context>
chip_gen: v6e
topology: v6e:2x2x1
jax: 0.10.0
libtpu: 0.0.40
codegen_flags: <defaults>
</compile_context>

<pallas_src>
import functools

import jax
import jax.numpy as jnp
from jax.experimental import pallas as pl
from jax.experimental.pallas import tpu as pltpu

_LANES = 128
_MAX_UNROLLED_CHUNKS = 128


def _se_kernel(x_ref, wd_ref, bd_ref, wu_ref, bu_ref, o_ref, *, inv_hw):
    # x_ref: (Bt, C, HW) tile in the input dtype.
    x = x_ref[...]
    hw = x.shape[-1]

    # ---- Global average pool (f32 accumulation) ---------------------------
    # Pre-accumulate 128-lane chunks with plain VPU adds, then do ONE
    # cross-lane (XLU) reduce over a (Bt, C, 128) accumulator.  This keeps
    # XLU work proportional to Bt*C/8 instead of the full tile vreg count,
    # which matters at v7x's 3.2 TB/s HBM with only 2 XLUs.
    n_chunks = hw // _LANES
    if hw % _LANES == 0 and 1 < n_chunks <= _MAX_UNROLLED_CHUNKS:
        acc = x[:, :, 0:_LANES].astype(jnp.float32)
        for j in range(1, n_chunks):                      # static slices, unrolled
            acc = acc + x[:, :, j * _LANES:(j + 1) * _LANES].astype(jnp.float32)
        pooled = jnp.sum(acc, axis=-1) * inv_hw           # (Bt, C)
    else:
        pooled = jnp.sum(x, axis=-1, dtype=jnp.float32) * inv_hw

    # ---- Squeeze-excite MLP (tiny, f32) ------------------------------------
    h = jnp.dot(pooled, wd_ref[...], preferred_element_type=jnp.float32)
    h = jnp.maximum(h + bd_ref[...], 0.0)                  # (Bt, internal)
    u = jnp.dot(h, wu_ref[...], preferred_element_type=jnp.float32)
    s = jax.nn.sigmoid(u + bu_ref[...])                    # (Bt, C)

    # ---- Scale the input by per-channel gates (streaming, input dtype) ----
    o_ref[...] = (x * s.astype(x.dtype)[:, :, None]).astype(o_ref.dtype)


def _vmem_capacity_bytes():
    """Physical VMEM of the attached TPU; conservative (v7x) default otherwise."""
    try:
        return int(pltpu.get_tpu_info().vmem_capacity_bytes)
    except Exception:
        return 64 << 20


def _weight_spec(shape):
    """Constant-index block; single-buffered when the API supports it."""
    index_map = lambda b: (0, 0)
    if hasattr(pl, "Buffered"):
        try:
            return pl.BlockSpec(shape, index_map, pipeline_mode=pl.Buffered(1))
        except TypeError:
            pass
    return pl.BlockSpec(shape, index_map)


def _x_spec(block_shape, single_buffer):
    index_map = lambda b: (b, 0, 0)
    if single_buffer and hasattr(pl, "Buffered"):
        try:
            return pl.BlockSpec(block_shape, index_map, pipeline_mode=pl.Buffered(1))
        except TypeError:
            pass
    return pl.BlockSpec(block_shape, index_map)


def se_block(x, wd_t, bd, wu_t, bu, *, target_tile_bytes=16 << 20):
    """SEBlock forward. x: (B, C, H, W), NCHW. Returns (B, C, H, W).

    NOTE: x is donated to the output (input_output_aliases); do not read x
    after this call.
    """
    B, C, H, W = x.shape
    HW = H * W
    internal = wd_t.shape[1]
    itemsize = jnp.dtype(x.dtype).itemsize

    # Pre-cast weights/biases to the f32 compute dtype once, outside the kernel.
    wd_t = jnp.asarray(wd_t, jnp.float32)
    bd = jnp.asarray(bd, jnp.float32).reshape(1, internal)
    wu_t = jnp.asarray(wu_t, jnp.float32)
    bu = jnp.asarray(bu, jnp.float32).reshape(1, C)

    # Lane-dense layout: flatten spatial dims (free for contiguous NCHW).
    # Do NOT add a standalone transpose to NHWC here -- it would double HBM
    # traffic for a mem-bound op.
    x_flat = x.reshape(B, C, HW)

    per_sample_bytes = C * HW * itemsize
    weight_bytes = sum(int(a.size) * jnp.dtype(a.dtype).itemsize
                       for a in (wd_t, bd, wu_t, bu))
    headroom = 2 << 20  # f32 pool accumulator, gate temps, misc slack

    # Generation-aware VMEM budget (64 MiB physical on v7x, 128 MiB on v5e/v6e).
    vmem_cap = _vmem_capacity_bytes()
    vmem_limit_cap = int(vmem_cap * 3 // 4)        # ~48 MiB v7x, ~96 MiB v6e/v5e

    # Per-step x-tile budget: 2 input + 2 output pipeline buffers must fit.
    tile_budget = min(
        target_tile_bytes,
        max(per_sample_bytes, (vmem_limit_cap - 2 * weight_bytes - headroom) // 4),
    )

    # Big-slab fallback: a single sample can't double-buffer -> single-buffer x.
    single_buffer_x = (per_sample_bytes * 4 + 2 * weight_bytes + headroom
                       > vmem_limit_cap)
    # TODO(synk): if even a single-buffered (2x) slab overflows VMEM, a two-pass
    # spatially-tiled variant (pool pass over an "arbitrary" HW grid axis, then
    # a scale pass) is required; not implemented here.

    if single_buffer_x:
        Bt = 1
    else:
        Bt = max(1, min(B, tile_budget // max(per_sample_bytes, 1)))
        if B >= 2:
            # >= 2 grid steps so the parallel batch axis keeps both v7x
            # TensorCores (and megacore on v5e/v6e) busy.
            Bt = min(Bt, pl.cdiv(B, 2))

    grid = (pl.cdiv(B, Bt),)   # ragged last block is fine (gates per-sample)

    tile_bytes = Bt * per_sample_bytes
    x_bufs = 2 if single_buffer_x else 4
    vmem_needed = x_bufs * tile_bytes + 2 * weight_bytes + headroom
    vmem_limit = int(min(max(vmem_needed, 8 << 20), vmem_limit_cap))

    cost = pl.CostEstimate(
        flops=2 * B * C * internal * 2 + 2 * B * C * HW,
        transcendentals=B * C,
        bytes_accessed=2 * B * C * HW * itemsize + weight_bytes,
    )

    kernel = functools.partial(_se_kernel, inv_hw=float(1.0 / HW))

    out_flat = pl.pallas_call(
        kernel,
        out_shape=jax.ShapeDtypeStruct((B, C, HW), x.dtype),
        grid_spec=pltpu.PrefetchScalarGridSpec(
            num_scalar_prefetch=0,
            grid=grid,
            in_specs=[
                _x_spec((Bt, C, HW), single_buffer_x),
                _weight_spec((C, internal)),
                _weight_spec((1, internal)),
                _weight_spec((internal, C)),
                _weight_spec((1, C)),
            ],
            out_specs=_x_spec((Bt, C, HW), single_buffer_x),
        ),
        compiler_params=pltpu.CompilerParams(
            dimension_semantics=("parallel",),
            vmem_limit_bytes=vmem_limit,
        ),
        cost_estimate=cost,
        # Each block is fully read into VMEM before its writeback -> safe to
        # alias; halves the HBM footprint around the call.  x is donated.
        input_output_aliases={0: 0},
    )(x_flat, wd_t, bd, wu_t, bu)

    return out_flat.reshape(B, C, H, W)


def se_block_ref(x, wd_t, bd, wu_t, bu):
    """Pure-JAX reference mirroring the PyTorch forward."""
    pooled = jnp.mean(x.astype(jnp.float32), axis=(2, 3))      # (B, C)
    h = jnp.maximum(pooled @ wd_t + bd, 0.0)                    # (B, internal)
    s = jax.nn.sigmoid(h @ wu_t + bu)                           # (B, C)
    return (x * s.astype(x.dtype)[:, :, None, None]).astype(x.dtype)


if __name__ == "__main__":
    B, C, internal, H, W = 2, 4, 2, 16, 16

    key = jax.random.PRNGKey(0)
    kx, kwd, kbd, kwu, kbu = jax.random.split(key, 5)

    x = jax.random.normal(kx, (B, C, H, W), dtype=jnp.float32)

    # PyTorch shapes: down.weight (internal, C, 1, 1), up.weight (C, internal, 1, 1)
    wd = jax.random.normal(kwd, (internal, C), dtype=jnp.float32) * 0.1
    bd = jax.random.normal(kbd, (internal,), dtype=jnp.float32) * 0.1
    wu = jax.random.normal(kwu, (C, internal), dtype=jnp.float32) * 0.1
    bu = jax.random.normal(kbu, (C,), dtype=jnp.float32) * 0.1

    wd_t = wd.T                       # (C, internal)
    wu_t = wu.T                       # (internal, C)

    # Compute the reference FIRST: se_block donates x to its output.
    ref = se_block_ref(x, wd_t, bd.reshape(1, internal), wu_t, bu.reshape(1, C))
    ref = jax.block_until_ready(ref)

    out = se_block(x, wd_t, bd, wu_t, bu)
    out = jax.block_until_ready(out)

    assert out.shape == (B, C, H, W)
    assert jnp.allclose(out, ref, atol=1e-5, rtol=1e-5), "mismatch vs reference"

    print("KERNEL_OK")
</pallas_src>

<mosaic_0001>
module attributes {stable_mosaic.version = 11 : i64} {
  func.func @_se_kernel(%arg0: i32, %arg1: memref<1x4x256xf32, #tpu.memory_space<vmem>>, %arg2: memref<4x2xf32, #tpu.memory_space<vmem>>, %arg3: memref<1x2xf32, #tpu.memory_space<vmem>>, %arg4: memref<2x4xf32, #tpu.memory_space<vmem>>, %arg5: memref<1x4xf32, #tpu.memory_space<vmem>>, %arg6: memref<1x4x256xf32, #tpu.memory_space<vmem>>) attributes {dimension_semantics = [#tpu.dimension_semantics<parallel>], iteration_bounds = array<i64: 2>, scalar_prefetch = 0 : i64, scratch_operands = 0 : i64, tpu.core_type = #tpu.core_type<tc>, window_params = [{transform_indices = @transform_0, window_bounds = array<i64: 1, 4, 256>}, {pipeline_mode = #tpu.pipeline_mode<synchronous>, transform_indices = @transform_1, window_bounds = array<i64: 4, 2>}, {pipeline_mode = #tpu.pipeline_mode<synchronous>, transform_indices = @transform_2, window_bounds = array<i64: 1, 2>}, {pipeline_mode = #tpu.pipeline_mode<synchronous>, transform_indices = @transform_3, window_bounds = array<i64: 2, 4>}, {pipeline_mode = #tpu.pipeline_mode<synchronous>, transform_indices = @transform_4, window_bounds = array<i64: 1, 4>}, {transform_indices = @transform_5, window_bounds = array<i64: 1, 4, 256>}]} {
    %c0 = arith.constant 0 : index
    %c0_0 = arith.constant 0 : index
    %c0_1 = arith.constant 0 : index
    %0 = vector.load %arg1[%c0, %c0_0, %c0_1] : memref<1x4x256xf32, #tpu.memory_space<vmem>>, vector<1x4x256xf32>
    %1 = vector.extract_strided_slice %0 {offsets = [0, 0, 0], sizes = [1, 4, 128], strides = [1, 1, 1]} : vector<1x4x256xf32> to vector<1x4x128xf32>
    %2 = vector.extract_strided_slice %0 {offsets = [0, 0, 128], sizes = [1, 4, 128], strides = [1, 1, 1]} : vector<1x4x256xf32> to vector<1x4x128xf32>
    %3 = arith.addf %1, %2 : vector<1x4x128xf32>
    %cst = arith.constant dense<0.000000e+00> : vector<1x4xf32>
    %4 = vector.multi_reduction <add>, %3, %cst [2] : vector<1x4x128xf32> to vector<1x4xf32>
    %cst_2 = arith.constant 3.906250e-03 : f32
    %5 = vector.broadcast %cst_2 : f32 to vector<1x4xf32>
    %6 = arith.mulf %4, %5 : vector<1x4xf32>
    %c0_3 = arith.constant 0 : index
    %c0_4 = arith.constant 0 : index
    %7 = vector.load %arg2[%c0_3, %c0_4] : memref<4x2xf32, #tpu.memory_space<vmem>>, vector<4x2xf32>
    %cst_5 = arith.constant dense<0.000000e+00> : vector<1x2xf32>
    %8 = tpu.matmul %6, %7, %cst_5 {dimension_numbers = #tpu.dot_dimension_numbers<[1], [0], [0], [1], [0, 0, 1, 1], [], []>} : vector<1x4xf32>, vector<4x2xf32>, vector<1x2xf32> -> vector<1x2xf32>
    %c0_6 = arith.constant 0 : index
    %c0_7 = arith.constant 0 : index
    %9 = vector.load %arg3[%c0_6, %c0_7] : memref<1x2xf32, #tpu.memory_space<vmem>>, vector<1x2xf32>
    %10 = arith.addf %8, %9 : vector<1x2xf32>
    %cst_8 = arith.constant 0.000000e+00 : f32
    %11 = vector.broadcast %cst_8 : f32 to vector<1x2xf32>
    %12 = arith.maximumf %10, %11 : vector<1x2xf32>
    %c0_9 = arith.constant 0 : index
    %c0_10 = arith.constant 0 : index
    %13 = vector.load %arg4[%c0_9, %c0_10] : memref<2x4xf32, #tpu.memory_space<vmem>>, vector<2x4xf32>
    %cst_11 = arith.constant dense<0.000000e+00> : vector<1x4xf32>
    %14 = tpu.matmul %12, %13, %cst_11 {dimension_numbers = #tpu.dot_dimension_numbers<[1], [0], [0], [1], [0, 0, 1, 1], [], []>} : vector<1x2xf32>, vector<2x4xf32>, vector<1x4xf32> -> vector<1x4xf32>
    %c0_12 = arith.constant 0 : index
    %c0_13 = arith.constant 0 : index
    %15 = vector.load %arg5[%c0_12, %c0_13] : memref<1x4xf32, #tpu.memory_space<vmem>>, vector<1x4xf32>
    %16 = arith.addf %14, %15 : vector<1x4xf32>
    %17 = arith.negf %16 : vector<1x4xf32>
    %18 = math.exp %17 : vector<1x4xf32>
    %cst_14 = arith.constant 1.000000e+00 : f32
    %19 = vector.broadcast %cst_14 : f32 to vector<1x4xf32>
    %20 = arith.addf %19, %18 : vector<1x4xf32>
    %21 = arith.divf %19, %20 : vector<1x4xf32>
    %22 = vector.shape_cast %21 : vector<1x4xf32> to vector<1x4x1xf32>
    %23 = vector.broadcast %22 : vector<1x4x1xf32> to vector<1x4x256xf32>
    %24 = arith.mulf %0, %23 : vector<1x4x256xf32>
    %c0_15 = arith.constant 0 : index
    %c0_16 = arith.constant 0 : index
    %c0_17 = arith.constant 0 : index
    %25 = vector.load %arg6[%c0_15, %c0_16, %c0_17] : memref<1x4x256xf32, #tpu.memory_space<vmem>>, vector<1x4x256xf32>
    tpu.vector_store %arg6[%c0_15, %c0_16, %c0_17], %24 {strides = array<i32>} : memref<1x4x256xf32, #tpu.memory_space<vmem>>, vector<1x4x256xf32>,
    return
  }
  func.func @transform_0(%arg0: i32) -> (i32, i32, i32) {
    %c0_i32 = arith.constant 0 : i32
    %c0_i32_0 = arith.constant 0 : i32
    %c0_i32_1 = arith.constant 0 : i32
    return %arg0, %c0_i32, %c0_i32_0 : i32, i32, i32
  }
  func.func @transform_1(%arg0: i32) -> (i32, i32) {
    %c0_i32 = arith.constant 0 : i32
    %c0_i32_0 = arith.constant 0 : i32
    %c0_i32_1 = arith.constant 0 : i32
    return %c0_i32, %c0_i32_0 : i32, i32
  }
  func.func @transform_2(%arg0: i32) -> (i32, i32) {
    %c0_i32 = arith.constant 0 : i32
    %c0_i32_0 = arith.constant 0 : i32
    %c0_i32_1 = arith.constant 0 : i32
    return %c0_i32, %c0_i32_0 : i32, i32
  }
  func.func @transform_3(%arg0: i32) -> (i32, i32) {
    %c0_i32 = arith.constant 0 : i32
    %c0_i32_0 = arith.constant 0 : i32
    %c0_i32_1 = arith.constant 0 : i32
    return %c0_i32, %c0_i32_0 : i32, i32
  }
  func.func @transform_4(%arg0: i32) -> (i32, i32) {
    %c0_i32 = arith.constant 0 : i32
    %c0_i32_0 = arith.constant 0 : i32
    %c0_i32_1 = arith.constant 0 : i32
    return %c0_i32, %c0_i32_0 : i32, i32
  }
  func.func @transform_5(%arg0: i32) -> (i32, i32, i32) {
    %c0_i32 = arith.constant 0 : i32
    %c0_i32_0 = arith.constant 0 : i32
    %c0_i32_1 = arith.constant 0 : i32
    return %arg0, %c0_i32, %c0_i32_0 : i32, i32, i32
  }
}

</mosaic_0001>

<bundles_post_ra>
// kernel: tpu_custom_call.1
= control target key start
LH: loop header
LB: loop body
LE: loop exit
PB: predicated region body
PF: predicated region fallthrough
CT: control target
= control target key end

     0   :  { %10 = vsyncpa [#allocation3], 0  ;;  %s900_s0 = inlined_call_operand.hbm [shape: f32[2,4,256], index: 0, kind: input, shape index: {}, may-alias: {0,5}]   ;;  %s901_s1 = inlined_call_operand.vmem [shape: f32[4,2], index: 1, kind: input, shape index: {}]   ;;  %s902_s2 = inlined_call_operand.vmem [shape: f32[1,2], index: 2, kind: input, shape index: {}]   ;;  %s903_s3 = inlined_call_operand.vmem [shape: f32[2,4], index: 3, kind: input, shape index: {}]   ;;  %s904_s4 = inlined_call_operand.vmem [shape: f32[1,4], index: 4, kind: input, shape index: {}]   ;;  %s905_s5 = inlined_call_operand.hbm [shape: f32[2,4,256], index: 5, kind: output, shape index: {}, may-alias: {0,5}]  }
   0x1   :  { %12 = vsyncpa [#allocation3 + $0x1], 0 }
   0x2   :  { %13 = vsyncpa [#allocation4], 0 }
   0x3   :  { %15 = vsyncpa [#allocation4 + $0x1], 0  ;;  %s743_s18 = smov 0   ;;  %s745_s19 = smov 0  }
   0x4   :  { %s747_s20 = smov 0   ;;  %s749_s21 = smov 0  }
   0x5 LB: > { %s764_s22 = sadd.s32 4294967295, %s706_s21   ;;  %s526_s23 = sadd.s32 4294967294, %s706_s21   ;;  %s706_s21 = sphi %s749_s21, %s922_s21   ;;  %s702_s20 = sphi %s747_s20, %s921_s20   ;;  %s698_s19 = sphi %s745_s19, %s920_s19   ;;  %s694_s18 = sphi %s743_s18, %s919_s18  }
   0x6   : > { %s768_s24 = sadd.s32 1, %s706_s21   ;;  %s28_s25 = sadd.s32 1, %s702_s20 }
   0x7   : > { %s25_s26 = ssub.s32 %s706_s21, %s768_s24  ;;  %p35_p0 = scmp.ne.s32.totalorder %s702_s20, %s698_s19 }
   0x8   : > { %p26_p1 = scmp.eq.s32.totalorder %s25_s26, 0  ;;  %p36_p2 = scmp.eq.s32.totalorder %s706_s21, 0 }
   0x9   : > { %p41_p3 = scmp.ne.s32.totalorder %s698_s19, %s694_s18  ;;  %p42_p4 = scmp.eq.s32.totalorder %s764_s22, 0 }
   0xa   : > { %s780_s27 = scalar_select %p26_p1, %s702_s20, %s28_s25  }
   0xb   : > { %p782_p5 = por %p36_p2, %p35_p0  ;;  %p786_p6 = por %p42_p4, %p41_p3 }
   0xc   : > { %p149_p7 = scmp.eq.s32.totalorder %s764_s22, 1  ;;  %p155_p8 = scmp.eq.s32.totalorder %s526_s23, 1 }
   0xd   : > { %s909_s29 = scalar_select %p786_p6, 1, 0 }
   0xe   : > { %p573_p10 = scmp.lt.s32.totalorder %s706_s21, 2  ;;  %p793_p11 = por %p149_p7, %p35_p0 }
   0xf   : > { %p797_p12 = por %p155_p8, %p41_p3  ;;  %s187_s7 = sand.u32 1, %s702_s20  }
  0x10   : > { %s910_s30 = scalar_select %p793_p11, 1, 0 }
  0x11   : > { %s911_s6 = scalar_select %p797_p12, 1, 0 }
  0x12   : > { %s545_s8 = sshll.u32 %s706_s21, 7  ;;  %s529_s9 = sshll.u32 %s187_s7, 3 }
  0x13   : > { %s806_s12 = scalar_lea.hbm %s900_s0, %s545_s8  ;;  %s191_s13 = scalar_lea.vmem [#allocation2], %s529_s9 }
  0x14   : > { %s199_s14 = sshll.u32 %s191_s13, 4  ;;  %p810_p13 = pnand %p573_p10, %p782_p5  ;;  %s814_s14 = int_to_ptr.vmem [resolvable:$true] %s199_s14 }
  0x15   : > { %s188_s16 = scalar_lea.sflag [#allocation3], %s187_s7  ;;  %s614_s17 = scalar_lea.hbm %s806_s12, 128 }
  0x16   : > { %p615_p2 = scmp.ne.s32.totalorder %s806_s12, %s614_s17  ;;  %p616_p3 = pneg %p810_p13 }
  0x17   : > { %s619_s26 = scalar_lea.hbm %s900_s0, 256  ;;  %p620_p5 = scmp.lt.s32.totalorder %s806_s12, %s900_s0 }
  0x18   : > { %p617_p4 = pnand %p616_p3, %p615_p2  ;;  %p621_p8 = scmp.lt.s32.totalorder %s619_s26, %s614_s17 }
  0x1a   : > { %p618_p7 = pneg %p617_p4  ;;  %p622_p10 = por %p621_p8, %p620_p5 }
  0x1c   : > { %p623_p9 = pnand %p622_p10, %p618_p7 }
  0x1e   : > { %626 = shalt.err (!%p623_p9)
}
  0x1f   : > { %s627_s7 = scalar_lea.vmem %s814_s14, 128  ;;  %s708_s9 = smov [#allocation2]  }
  0x20   : > { %p628_p0 = scmp.ne.s32.totalorder %s814_s14, %s627_s7  ;;  %s632_s10 = sshll.u32 %s708_s9, 4  ;;  %s633_s10 = int_to_ptr.vmem [resolvable:$false] %s632_s10 }
  0x21   : > { %s634_s11 = scalar_lea.vmem %s633_s10, 256  ;;  %p635_p4 = scmp.lt.s32.totalorder %s814_s14, %s633_s10 }
  0x22   : > { %p630_p1 = pnand %p628_p0, %p616_p3  ;;  %p636_p12 = scmp.lt.s32.totalorder %s634_s11, %s627_s7 }
  0x24   : > { %p631_p2 = pneg %p630_p1  ;;  %p637_p11 = por %p636_p12, %p635_p4 }
  0x26   : > { %p638_p6 = pnand %p637_p11, %p631_p2 }
  0x28   : > { %641 = shalt.err (!%p638_p6)
}
  0x29   : > { %568 = dma.hbm_to_vmem [thread:$0]  (!%p810_p13), %s806_s12, 128, %s814_s14, %s188_s16  }
  0x2a   : > { %p913_p9 = scmp.lt.s32.totalorder %s706_s21, 3  ;;  %p914_p7 = scmp.ge.s32.totalorder %s706_s21, 1 }
  0x2c   : > { %p205_p0 = pnand %p914_p7, %p913_p9 }
  0x2d   : > { %s841_s13 = sand.u32 (!%p205_p0), 1, %s698_s19   ;;  %p915_p6 = scmp.ne.s32.totalorder (!%p205_p0), %s909_s29, 0 }
  0x2e   : > { %208 = sbr.rel (%p205_p0) target bundleno = 758 (0x2f6), region = 40  ;;  %s533_s17 = sshll.u32 (!%p205_p0), %s841_s13, 3 }
  0x2f   : > { %s211_s23 = scalar_lea.sflag (!%p205_p0), [#allocation3], %s841_s13  ;;  %s214_s15 = scalar_lea.vmem (!%p205_p0), [#allocation2], %s533_s17 }
  0x33   : > { %685 = dma.done.wait (%p915_p6), %s211_s23, 128  }
  0x34   : > { %687 = vsyncadd (%p915_p6), %s211_s23, 4294967168  ;;  %v241_v0 = vld [vmem:[%s214_s15] sm:$0xff]  ;;  %vm246_vm0 = vcmask 1043456   ;;  %v709_v4 = vmov 0.0   ;;  %vm710_vm1 = vmmov 0   ;;  %v254_v6 = vlaneseq  ;;  %s546_s7 = sshll.u32 %s764_s22, 7 }
  0x35   : > { %v243_v1 = vrot.slane %v241_v0, 4  ;;  %551 = vmatprep.subr.mxu0 %v709_v4  ;;  %v251_v5 = vld [vmem:[%s901_s1] sm:$0xf]  ;;  %556 = vmatprep.subr.mxu1 %v709_v4  ;;  %vm260_vm2 = vcmask 31744   ;;  %vm343_vm3 = vcmask 1041408   ;;  %vm339_vm4 = vcmask 15360   ;;  %s454_s15 = scalar_lea.hbm %s905_s5, %s546_s7 }
  0x36   : > { %552 = vmatpush3.msk.msra.mxu0 %vm246_vm0, %v251_v5  ;;  %553 = vmatprep.mubr.msk.f32.mxu0 %vm710_vm1, %v709_v4  ;;  %v255_v7 = vand.u32 127, %v254_v6  ;;  %v257_v8 = vshrl.u32 %v254_v6, 7  ;;  %v337_v13 = vld [vmem:[%s903_s3] sm:$0x3]  ;;  %v711_v29 = vmov 839922192  }
  0x37   : > { %v245_v2 = vadd.f32 %v243_v1, %v241_v0  ;;  %558 = vmatprep.mubr.msk.f32.mxu1 %vm710_vm1, %v709_v4  ;;  %557 = vmatpush3.msk.msra.mxu1 %vm343_vm3, %v337_v13  ;;  %v252_v14 = vld [vmem:[%s902_s2] sm:$0x1]  ;;  %v432_v30 = vunpack.c.l.s4 %v711_v29  ;;  %s240_s9 = scalar_lea.vmem [#allocation5], %s533_s17  ;;  %s442_s12 = scalar_lea.sflag [#allocation4], %s841_s13 }
  0x38   : > { %v258_v9 = vsub.s32 %v255_v7, %v257_v8  ;;  %v338_v19 = vld [vmem:[%s904_s4] sm:$0x1]  ;;  %v425_v26 = vsub.s32 0, %v257_v8  ;;  %s456_s10 = sshll.u32 %s240_s9, 4  ;;  %p916_p12 = scmp.ne.s32.totalorder %s910_s30, 0  ;;  %s457_s10 = int_to_ptr.vmem [resolvable:$true] %s456_s10 }
  0x39   : > { %v247_v3 = vsel %vm246_vm0, %v245_v2, 0.0  ;;  %v433_v31 = vunpack.c.0.s8 %v432_v30  ;;  %s642_s14 = scalar_lea.vmem %s457_s10, 128  ;;  %s712_s29 = smov [#allocation5]  }
  0x3a   : > { %248 = vadd.xlane.f32.xlu0 %v247_v3  ;;  %p643_p11 = scmp.ne.s32.totalorder %s457_s10, %s642_s14  ;;  %s646_s16 = sshll.u32 %s712_s29, 4  ;;  %s647_s16 = int_to_ptr.vmem [resolvable:$false] %s646_s16 }
  0x3b   : > { %v436_v32 = vsub.s32 %v433_v31, %v257_v8  ;;  %s648_s22 = scalar_lea.vmem %s647_s16, 256  ;;  %p649_p3 = scmp.lt.s32.totalorder %s457_s10, %s647_s16 }
  0x3c   : > { %p644_p13 = pnand %p643_p11, %p916_p12  ;;  %p650_p5 = scmp.lt.s32.totalorder %s648_s22, %s642_s14 }
  0x3e   : > { %p645_p1 = pneg %p644_p13  ;;  %p651_p8 = por %p650_p5, %p649_p3 }
  0x40   : > { %p652_p10 = pnand %p651_p8, %p645_p1 }
  0xc3   : > { %v249_v10 = vpop.xlane.xlu0 %248 }
  0xc4   : > { %v250_v11 = vmul.f32 0.00390625, %v249_v10 }
  0xc6   : > { %v259_v12 = vrot.slane %v250_v11, %v258_v9 }
  0xc8   : > { %554 = vmatmul.mubr.msk.f32.vlgmr.msra.gmra.mxu0 %vm260_vm2, %v259_v12 }
 0x188   : > { %v332_v15 = vpop.f32.mrf.mxu0 }
 0x189   : > { %v333_v16 = vadd.f32 %v332_v15, %v252_v14 }
 0x18a   : > { %v555_v17 = vpop.f32.mrf.mxu0 }
 0x18b   : > { %v336_v18 = vmax.f32 %v333_v16, 0.0 }
 0x18d   : > { %559 = vmatmul.mubr.msk.f32.vlgmr.msra.gmra.mxu1 %vm339_vm4, %v336_v18 }
 0x24d   : > { %v413_v20 = vpop.f32.mrf.mxu1 }
 0x24e   : > { %v414_v21 = vadd.f32 %v413_v20, %v338_v19 }
 0x24f   : > { %v560_v22 = vpop.f32.mrf.mxu1 }
 0x250   : > { %v539_v23 = vmul.f32 -1.442695, %v414_v21 }
 0x252   : > { %610 = vpow2.f32 %v539_v23 }
 0x25f   : > { %v611_v24 = vpop.eup %610 }
 0x260   : > { %v420_v25 = vadd.f32 1.0, %v611_v24 }
 0x262   : > { %612 = vrcp.f32 %v420_v25 }
 0x26f   : > { %v613_v27 = vpop.eup %612 }
 0x270   : > { %v426_v28 = vrot.slane %v613_v27, %v425_v26 }
 0x272   : > { %428 = vbcast.lane.b32.xlu0 %v426_v28, 256 }
 0x2e4   : > { %v429_v33 = vpop.permute.xlu0 %428 }
 0x2e5   : > { %v437_v34 = vrot.slane %v429_v33, %v436_v32 }
 0x2e7   : > { %v439_v35 = vmul.f32 %v437_v34, %v241_v0 }
 0x2e9   : > { %440 = vst [vmem:[%s240_s9] sm:$0xff] %v439_v35 }
 0x2ea   : > { %655 = shalt.err (!%p652_p10)
}
 0x2eb   : > { %s656_s17 = scalar_lea.hbm %s454_s15, 128  ;;  %s660_s26 = scalar_lea.hbm %s905_s5, 256 }
 0x2ec   : > { %p657_p2 = scmp.ne.s32.totalorder %s454_s15, %s656_s17  ;;  %p661_p7 = scmp.lt.s32.totalorder %s454_s15, %s905_s5 }
 0x2ed   : > { %p662_p0 = scmp.lt.s32.totalorder %s660_s26, %s656_s17 }
 0x2ee   : > { %p658_p4 = pnand %p657_p2, %p916_p12 }
 0x2ef   : > { %p663_p6 = por %p662_p0, %p661_p7 }
 0x2f0   : > { %p659_p9 = pneg %p658_p4 }
 0x2f2   : > { %p664_p11 = pnand %p663_p6, %p659_p9 }
 0x2f4   : > { %667 = shalt.err (!%p664_p11)
}
 0x2f5   : > { %563 = dma.vmem_to_hbm [thread:$0]  (%p916_p12), %s457_s10, 128, %s454_s15, %s442_s12  }
 0x2f6 PF: > { %s468_s7 = sand.u32 1, %s694_s18   ;;  %p917_p13 = scmp.ne.s32.totalorder %s911_s6, 0 }
 0x2f7   : > { %p918_p1 = scmp.ge.s32.totalorder %s706_s21, 2  ;;  %s469_s9 = scalar_lea.sflag [#allocation4], %s468_s7 }
 0x2f9   : > { %p570_p3 = pnand %p918_p1, %p917_p13 }
 0x2fb   : > { %p571_p5 = pneg %p570_p3 }
 0x2fd   : > { %689 = dma.done.wait (%p571_p5), %s469_s9, 128  }
 0x2fe   : > { %691 = vsyncadd (%p571_p5), %s469_s9, 4294967168  ;;  %p18_p8 = scmp.ge.s32.totalorder %s768_s24, 4   ;;  %s919_s18 = smov %s698_s19 }
 0x2ff   : > { %s920_s19 = smov %s702_s20  ;;  %s921_s20 = smov %s780_s27 }
 0x300   : > { %s922_s21 = smov %s768_s24  ;;  %20 = sbr.rel (!%p18_p8) target bundleno = 5 (0x5), region = 85 }
 0x305   :  { %474 = vsyncpa [#allocation3], 1 }
 0x306   :  { %476 = vsyncpa [#allocation3 + $0x1], 1 }
 0x307   :  { %477 = vsyncpa [#allocation4], 1 }
 0x308   :  { %479 = vsyncpa [#allocation4 + $0x1], 1 }

</bundles_post_ra>
